<compile_context>
chip_gen: v5e
topology: v5e:2x2
jax: 0.10.0
libtpu: 0.0.40
codegen_flags: <defaults>
</compile_context>

<pallas_src>
import jax
import jax.numpy as jnp
from jax import lax
from jax.experimental import pallas as pl
from jax.experimental.pallas import tpu as pltpu


def _round_up(x, m):
    return ((x + m - 1) // m) * m


# -----------------------------------------------------------------------------
# Pallas kernel: out_tile = W_fold_chunk @ g_tile + bias   (channels-first)
#   gallery  [C, HW]     streamed as (C, ts) tiles        (HW on lanes)
#   weight   [n*C, C]    folded per-instance weights, chunked on sublanes
#   output   [n*C, HW]   written as (ic*C, ts) tiles      (lane-dense)
# No transposes anywhere: [n*C, HW] reshapes for free into [n, C, H, W].
# -----------------------------------------------------------------------------
def _rpn_modulator_kernel(w_ref, g_ref, b_ref, o_ref):
    # w_ref : [ic*C, C]  folded weight chunk (already in compute dtype)
    # g_ref : [C, TS]    gallery spatial tile (already in compute dtype)
    # b_ref : [ic*C, 1]  f32 proj_out bias (broadcast along lanes)
    # o_ref : [ic*C, TS]
    acc = jnp.dot(w_ref[...], g_ref[...], preferred_element_type=jnp.float32)
    o_ref[...] = (acc + b_ref[...]).astype(o_ref.dtype)


def _fold_queries_T(queries, wm, bm, wo2d, bo):
    """Fold the per-instance 7x7 query projection into the 1x1 proj_out weight,
    already transposed for the W @ g (channels-first) layout.

    queries: [n, C, 7, 7]
    wm:      [K, C]  (K = C*49, pre-transposed proj_modulator weight)
    bm:      [1, C]
    wo2d:    [C_out, C_in]  (proj_out conv weight in OI order, no transpose)
    bo:      [C]
    returns  Wt_big [n*C_out, C_in],  b_big [n*C_out, 1] (f32)
    """
    n, C, kh, kw = queries.shape
    K = C * kh * kw
    q = queries.reshape(n, K)
    # m[inst, c] = proj_modulator(query)[c]   (valid 7x7 conv on a 7x7 map)
    m = jnp.dot(q, wm, precision=lax.Precision.HIGHEST) + bm           # [n, C_in]
    # out[co] = sum_ci wo2d[co,ci] * (m[ci] * g[ci]) + bo[co]
    #         = sum_ci (m[ci] * wo2d[co,ci]) * g[ci] + bo[co]
    wt = m[:, None, :] * wo2d[None, :, :]                              # [n, C_out, C_in]
    Wt_big = wt.reshape(n * C, C)
    b_big = jnp.tile(bo.reshape(C, 1), (n, 1))                         # [n*C, 1]
    return Wt_big, b_big


def _vmem_cost_bytes(ts, ic, n_chunks, C, cdt_bytes, out_bytes):
    """Estimated VMEM footprint of the pipelined buffers for one grid step."""
    w_bufs = 1 if n_chunks == 1 else 2      # constant-index blocks -> 1 buffer
    gallery = 2 * C * ts * cdt_bytes        # streamed, double-buffered
    weight = w_bufs * ic * C * C * cdt_bytes
    bias = w_bufs * ic * C * 128 * 4        # [ic*C, 1] f32, lane-padded to 128
    out = 2 * ic * C * ts * out_bytes       # double-buffered output tile
    return gallery + weight + bias + out


def _choose_tiling(HW, C, n, cdt_bytes, out_bytes, tile_s, vmem_budget):
    """Pick (spatial tile, instances-per-chunk) that fit the VMEM budget."""
    ts = min(_round_up(tile_s, 128), _round_up(HW, 128))
    ic = n
    while True:
        n_chunks = pl.cdiv(n, ic)
        if _vmem_cost_bytes(ts, ic, n_chunks, C, cdt_bytes, out_bytes) <= vmem_budget:
            break
        if ts > 128:
            ts = max(128, (ts // 2) // 128 * 128)
        elif ic > 1:
            ic = max(1, ic // 2)
        else:
            break   # best effort: smallest legal tiling
    return ts, ic


def _maybe_single_buffered(block_shape, index_map, single_buffer):
    """Grid-invariant operands only need one VMEM buffer (reclaims the second
    copy the default double-buffering would allocate)."""
    if single_buffer:
        try:
            return pl.BlockSpec(block_shape, index_map,
                                pipeline_mode=pl.Buffered(1))
        except TypeError:
            # TODO(synk): this jax version's BlockSpec has no pipeline_mode kwarg.
            pass
    return pl.BlockSpec(block_shape, index_map)


def modulate_image_level(queries, gallery, wm, bm, wo2d, bo, *,
                         tile_s=512, compute_dtype=jnp.float32,
                         vmem_budget=40 * 1024 * 1024,
                         small_hw_threshold=128, bucket_instances=True):
    """All instances of one image at one pyramid level in a single pallas_call.

    queries : [n_inst, C, 7, 7]  RoI query features of this image
    gallery : [C, H, W]          search-image feature map at this level
    returns : [n_inst, C, H, W]
    """
    n, C, _, _ = queries.shape
    _, H, Wd = gallery.shape
    HW = H * Wd
    out_dtype = gallery.dtype

    # Bucket n_inst to a power of two so variable instance counts hit a small
    # set of kernel shapes (avoids Mosaic recompilation churn).
    n_b = int(pl.next_power_of_2(max(n, 1))) if bucket_instances else n

    cdt_bytes = jnp.dtype(compute_dtype).itemsize
    out_bytes = jnp.dtype(out_dtype).itemsize

    # Tiny pyramid levels: a 1-step grid's dispatch/pipeline overhead dominates
    # a microscopic matmul -- do them with one high-precision XLA dot instead.
    if HW < small_hw_threshold:
        if n_b > n:
            queries = jnp.pad(queries, ((0, n_b - n), (0, 0), (0, 0), (0, 0)))
        Wt_big, b_big = _fold_queries_T(queries, wm, bm, wo2d, bo)
        g2d = gallery.reshape(C, HW)
        out = jnp.dot(Wt_big, g2d, precision=lax.Precision.HIGHEST) + b_big
        return out.astype(out_dtype)[:n * C].reshape(n, C, H, Wd)

    ts, ic = _choose_tiling(HW, C, n_b, cdt_bytes, out_bytes, tile_s, vmem_budget)
    n_pad = pl.cdiv(n_b, ic) * ic
    if n_pad > n:
        queries = jnp.pad(queries, ((0, n_pad - n), (0, 0), (0, 0), (0, 0)))
    n_chunks = n_pad // ic
    N = n_pad * C

    Wt_big, b_big = _fold_queries_T(queries, wm, bm, wo2d, bo)     # [N, C], [N, 1]

    # Cast matmul operands to the compute dtype OUTSIDE the kernel (halves DMA
    # bytes and VMEM when bf16; no per-step recast of the invariant weight).
    Wt_c = Wt_big.astype(compute_dtype)
    g_c = gallery.reshape(C, HW).astype(compute_dtype)
    HW_pad = pl.cdiv(HW, ts) * ts
    if HW_pad != HW:
        g_c = jnp.pad(g_c, ((0, 0), (0, HW_pad - HW)))

    cost = _vmem_cost_bytes(ts, ic, n_chunks, C, cdt_bytes, out_bytes)
    # <= 64 MiB keeps us inside v7x physical VMEM; v5e/v6e have 128 MiB.
    vmem_limit = int(min(64 * 1024 * 1024,
                         max(32 * 1024 * 1024, cost + 8 * 1024 * 1024)))

    # Spatial axis OUTER, instance-chunk axis INNER: the gallery tile's block
    # index is constant across the inner sweep, so it is streamed from HBM
    # exactly once; both axes are independent -> "parallel" for megacore.
    grid = (HW_pad // ts, n_chunks)

    def _run(single_buffer):
        return pl.pallas_call(
            _rpn_modulator_kernel,
            out_shape=jax.ShapeDtypeStruct((N, HW_pad), out_dtype),
            grid_spec=pltpu.PrefetchScalarGridSpec(
                num_scalar_prefetch=0,
                grid=grid,
                in_specs=[
                    _maybe_single_buffered((ic * C, C), lambda s, j: (j, 0),
                                           single_buffer),
                    pl.BlockSpec((C, ts), lambda s, j: (0, s)),
                    _maybe_single_buffered((ic * C, 1), lambda s, j: (j, 0),
                                           single_buffer),
                ],
                out_specs=pl.BlockSpec((ic * C, ts), lambda s, j: (j, s)),
            ),
            compiler_params=pltpu.CompilerParams(
                dimension_semantics=("parallel", "parallel"),
                vmem_limit_bytes=vmem_limit),
        )(Wt_c, g_c, b_big)

    if n_chunks == 1:
        try:
            out = _run(True)
        except Exception:
            # Fallback if single-buffered pipelining is rejected by this jax.
            out = _run(False)
    else:
        out = _run(False)

    out = out[:n * C, :HW]
    return out.reshape(n, C, H, Wd)


# -----------------------------------------------------------------------------
# Plain-JAX glue: bbox2roi + SingleRoIExtractor (RoIAlign, level mapping)
# -----------------------------------------------------------------------------
def bbox2roi(bbox_list):
    rois = []
    for img_id, bboxes in enumerate(bbox_list):
        idx = jnp.full((bboxes.shape[0], 1), float(img_id), dtype=bboxes.dtype)
        rois.append(jnp.concatenate([idx, bboxes[:, :4]], axis=1))
    return jnp.concatenate(rois, axis=0)


def map_roi_levels(rois, num_levels, finest_scale=56):
    scale = jnp.sqrt((rois[:, 3] - rois[:, 1] + 1.0) * (rois[:, 4] - rois[:, 2] + 1.0))
    lvls = jnp.floor(jnp.log2(scale / finest_scale + 1e-6))
    return jnp.clip(lvls, 0, num_levels - 1).astype(jnp.int32)


def _bilinear_sample(feat, ys, xs):
    # feat: [C, H, W]; ys, xs: [N] float sample coords
    H, W = feat.shape[1], feat.shape[2]
    y = jnp.clip(ys, 0.0, H - 1.0)
    x = jnp.clip(xs, 0.0, W - 1.0)
    y0 = jnp.floor(y)
    x0 = jnp.floor(x)
    y1 = jnp.minimum(y0 + 1.0, H - 1.0)
    x1 = jnp.minimum(x0 + 1.0, W - 1.0)
    ly = y - y0
    lx = x - x0
    y0i, y1i = y0.astype(jnp.int32), y1.astype(jnp.int32)
    x0i, x1i = x0.astype(jnp.int32), x1.astype(jnp.int32)
    v00 = feat[:, y0i, x0i]
    v01 = feat[:, y0i, x1i]
    v10 = feat[:, y1i, x0i]
    v11 = feat[:, y1i, x1i]
    return (v00 * (1 - ly) * (1 - lx) + v01 * (1 - ly) * lx +
            v10 * ly * (1 - lx) + v11 * ly * lx)


def roi_align_single(feat, roi, spatial_scale, out_size=7, sample_num=2):
    # feat: [C, H, W]; roi: [4] = (x1, y1, x2, y2) in image coords
    C = feat.shape[0]
    x1, y1, x2, y2 = roi[0], roi[1], roi[2], roi[3]
    roi_start_w = x1 * spatial_scale
    roi_start_h = y1 * spatial_scale
    roi_w = jnp.maximum((x2 - x1) * spatial_scale, 1.0)
    roi_h = jnp.maximum((y2 - y1) * spatial_scale, 1.0)
    bin_w = roi_w / out_size
    bin_h = roi_h / out_size

    p = jnp.arange(out_size, dtype=jnp.float32)
    s = (jnp.arange(sample_num, dtype=jnp.float32) + 0.5) / sample_num
    ys = roi_start_h + (p[:, None] + s[None, :]) * bin_h          # [out, samp]
    xs = roi_start_w + (p[:, None] + s[None, :]) * bin_w          # [out, samp]

    Y = jnp.broadcast_to(ys[:, :, None, None],
                         (out_size, sample_num, out_size, sample_num)).reshape(-1)
    X = jnp.broadcast_to(xs[None, None, :, :],
                         (out_size, sample_num, out_size, sample_num)).reshape(-1)
    vals = _bilinear_sample(feat, Y, X)                            # [C, out*s*out*s]
    vals = vals.reshape(C, out_size, sample_num, out_size, sample_num)
    return vals.mean(axis=(2, 4))                                  # [C, out, out]


def learn(feats_z, gt_bboxes_z, strides):
    """RPN_Modulator.learn: RoI-extract the template features, grouped per image."""
    rois = bbox2roi(gt_bboxes_z)                  # [R, 5]
    num_levels = len(strides)                     # roi_extractor.num_inputs
    lvls = map_roi_levels(rois, num_levels)

    bbox_feats = []
    roi_idx = 0
    for img_id, bboxes in enumerate(gt_bboxes_z):
        for _ in range(bboxes.shape[0]):
            roi = rois[roi_idx, 1:]
            per_level = jnp.stack([
                roi_align_single(feats_z[l][img_id], roi, 1.0 / strides[l])
                for l in range(num_levels)
            ])                                    # [L, C, 7, 7]
            bbox_feats.append(per_level[lvls[roi_idx]])
            roi_idx += 1

    modulator = []
    roi_idx = 0
    for img_id, bboxes in enumerate(gt_bboxes_z):
        n = bboxes.shape[0]
        modulator.append(jnp.stack(bbox_feats[roi_idx:roi_idx + n]))  # [n_i, C, 7, 7]
        roi_idx += n
    return modulator


# -----------------------------------------------------------------------------
# RPN_Modulator module (forward = inference(feats_x, modulator=learn(...)))
# -----------------------------------------------------------------------------
def init_params(key, channels=256, roi_out_size=7, featmap_num=5):
    """normal_init(m, std=0.01): weight ~ N(0, 0.01), bias = 0."""
    params = {'w_mod': [], 'b_mod': [], 'w_out': [], 'b_out': []}
    for k in range(featmap_num):
        key, k1, k2 = jax.random.split(key, 3)
        params['w_mod'].append(
            0.01 * jax.random.normal(k1, (channels, channels, roi_out_size, roi_out_size),
                                     dtype=jnp.float32))
        params['b_mod'].append(jnp.zeros((channels,), dtype=jnp.float32))
        params['w_out'].append(
            0.01 * jax.random.normal(k2, (channels, channels, 1, 1), dtype=jnp.float32))
        params['b_out'].append(jnp.zeros((channels,), dtype=jnp.float32))
    return params


def _prepare_level_weights(params, k):
    """Reshape conv weights once per level (hoisted out of image/instance loops)."""
    w_mod = params['w_mod'][k]
    C, _, kh, kw = w_mod.shape
    K = C * kh * kw
    wm = w_mod.reshape(C, K).T                   # [K, C_out]  ((C_in, kh, kw) flat)
    bm = params['b_mod'][k].reshape(1, C)
    wo2d = params['w_out'][k].reshape(C, C)      # [C_out, C_in]  (OI, no transpose)
    bo = params['b_out'][k].reshape(C)
    return wm, bm, wo2d, bo


def rpn_modulator_forward(params, feats_z, feats_x, gt_bboxes_z, strides,
                          *, tile_s=512, compute_dtype=jnp.float32,
                          vmem_budget=40 * 1024 * 1024):
    modulator = learn(feats_z[:len(strides)], gt_bboxes_z, strides)

    num_levels = len(feats_x)
    level_w = [_prepare_level_weights(params, k) for k in range(num_levels)]

    n_imgs = feats_x[0].shape[0]
    for i in range(n_imgs):
        queries = modulator[i]                            # [n_inst, C, 7, 7]
        n_inst = queries.shape[0]
        # One pallas_call per (image, level), batched across all instances:
        # the gallery feature map is streamed from HBM exactly once per level.
        per_level = []
        for k in range(num_levels):
            wm, bm, wo2d, bo = level_w[k]
            per_level.append(
                modulate_image_level(queries, feats_x[k][i], wm, bm, wo2d, bo,
                                     tile_s=tile_s, compute_dtype=compute_dtype,
                                     vmem_budget=vmem_budget))
        for j in range(n_inst):
            out_ij = [per_level[k][j:j + 1] for k in range(num_levels)]
            yield out_ij, i, j


# -----------------------------------------------------------------------------
# Pure-JAX reference (lax.conv, NCHW) used to validate the Pallas kernel
# -----------------------------------------------------------------------------
def reference_modulate(query, gallery, w_mod, b_mod, w_out, b_out):
    q = query[None]
    g = gallery[None]
    dn = ('NCHW', 'OIHW', 'NCHW')
    prec = lax.Precision.HIGHEST
    m = lax.conv_general_dilated(q, w_mod, (1, 1), 'VALID',
                                 dimension_numbers=dn, precision=prec)
    m = m + b_mod.reshape(1, -1, 1, 1)
    t = m * g
    o = lax.conv_general_dilated(t, w_out, (1, 1), 'VALID',
                                 dimension_numbers=dn, precision=prec)
    o = o + b_out.reshape(1, -1, 1, 1)
    return o[0]


# -----------------------------------------------------------------------------
if __name__ == "__main__":
    key = jax.random.PRNGKey(0)

    # Small, module-consistent shapes (production: C=256, bigger feature maps).
    C = 32                        # channels
    roi_out_size = 7
    strides = [4, 8, 16, 32]      # roi_extractor featmap_strides
    featmap_num = 5
    n_imgs = 2
    img_size = 128
    level_strides = [4, 8, 16, 32, 64]
    level_sizes = [img_size // s for s in level_strides]   # [32, 16, 8, 4, 2]

    key, kz, kx, kp = jax.random.split(key, 4)
    feats_z, feats_x = [], []
    for hs in level_sizes:
        kz, kz1 = jax.random.split(kz)
        kx, kx1 = jax.random.split(kx)
        feats_z.append(jax.random.normal(kz1, (n_imgs, C, hs, hs), dtype=jnp.float32))
        feats_x.append(jax.random.normal(kx1, (n_imgs, C, hs, hs), dtype=jnp.float32))

    # Ground-truth template boxes (x1, y1, x2, y2), per image.
    gt_bboxes_z = [
        jnp.array([[8.0, 8.0, 40.0, 40.0]], dtype=jnp.float32),
        jnp.array([[4.0, 4.0, 30.0, 30.0],
                   [10.0, 12.0, 50.0, 60.0]], dtype=jnp.float32),
    ]

    params = init_params(kp, channels=C, roi_out_size=roi_out_size,
                         featmap_num=featmap_num)

    # Run the full forward (generator, matching the PyTorch module semantics).
    results = []
    for out_ij, i, j in rpn_modulator_forward(params, feats_z, feats_x,
                                              gt_bboxes_z, strides):
        results.append((out_ij, i, j))
    jax.block_until_ready([o for out_ij, _, _ in results for o in out_ij])

    # --- validation: f32 path, every (image, instance, level) ----------------
    modulator = learn(feats_z[:len(strides)], gt_bboxes_z, strides)
    for out_ij, i, j in results:
        query = modulator[i][j]
        for k in range(featmap_num):
            ref = reference_modulate(query, feats_x[k][i],
                                     params['w_mod'][k], params['b_mod'][k],
                                     params['w_out'][k], params['b_out'][k])
            got = out_ij[k][0]
            assert jnp.allclose(got, ref, rtol=1e-4, atol=1e-5), \
                f"f32 mismatch at image {i}, instance {j}, level {k}"

    # --- validation: forced multi-chunk (instance-split) grid path -----------
    wm, bm, wo2d, bo = _prepare_level_weights(params, 0)
    refs1 = [reference_modulate(modulator[1][j], feats_x[0][1],
                                params['w_mod'][0], params['b_mod'][0],
                                params['w_out'][0], params['b_out'][0])
             for j in range(modulator[1].shape[0])]
    chunked = modulate_image_level(modulator[1], feats_x[0][1], wm, bm, wo2d, bo,
                                   vmem_budget=128 * 1024)
    for j, ref in enumerate(refs1):
        assert jnp.allclose(chunked[j], ref, rtol=1e-4, atol=1e-5), \
            f"chunked-path mismatch at instance {j}"

    # --- validation: bf16 compute path (looser tolerance, per review) --------
    bf16_out = modulate_image_level(modulator[1], feats_x[0][1], wm, bm, wo2d, bo,
                                    compute_dtype=jnp.bfloat16)
    for j, ref in enumerate(refs1):
        assert jnp.allclose(bf16_out[j], ref, rtol=5e-2, atol=5e-3), \
            f"bf16-path mismatch at instance {j}"

    print("KERNEL_OK")
</pallas_src>

<mosaic_0001>
module attributes {stable_mosaic.version = 11 : i64} {
  func.func @_rpn_modulator_kernel(%arg0: i32, %arg1: i32, %arg2: memref<32x32xf32, #tpu.memory_space<vmem>>, %arg3: memref<32x512xf32, #tpu.memory_space<vmem>>, %arg4: memref<32x1xf32, #tpu.memory_space<vmem>>, %arg5: memref<32x512xf32, #tpu.memory_space<vmem>>) attributes {dimension_semantics = [#tpu.dimension_semantics<parallel>, #tpu.dimension_semantics<parallel>], iteration_bounds = array<i64: 2, 1>, scalar_prefetch = 0 : i64, scratch_operands = 0 : i64, tpu.core_type = #tpu.core_type<tc>, window_params = [{pipeline_mode = #tpu.pipeline_mode<synchronous>, transform_indices = @transform_0, window_bounds = array<i64: 32, 32>}, {transform_indices = @transform_1, window_bounds = array<i64: 32, 512>}, {pipeline_mode = #tpu.pipeline_mode<synchronous>, transform_indices = @transform_2, window_bounds = array<i64: 32, 1>}, {transform_indices = @transform_3, window_bounds = array<i64: 32, 512>}]} {
    %c0 = arith.constant 0 : index
    %c0_0 = arith.constant 0 : index
    %0 = vector.load %arg2[%c0, %c0_0] : memref<32x32xf32, #tpu.memory_space<vmem>>, vector<32x32xf32>
    %c0_1 = arith.constant 0 : index
    %c0_2 = arith.constant 0 : index
    %1 = vector.load %arg3[%c0_1, %c0_2] : memref<32x512xf32, #tpu.memory_space<vmem>>, vector<32x512xf32>
    %cst = arith.constant dense<0.000000e+00> : vector<32x512xf32>
    %2 = tpu.matmul %0, %1, %cst {dimension_numbers = #tpu.dot_dimension_numbers<[1], [0], [0], [1], [0, 0, 1, 1], [], []>} : vector<32x32xf32>, vector<32x512xf32>, vector<32x512xf32> -> vector<32x512xf32>
    %c0_3 = arith.constant 0 : index
    %c0_4 = arith.constant 0 : index
    %3 = vector.load %arg4[%c0_3, %c0_4] : memref<32x1xf32, #tpu.memory_space<vmem>>, vector<32x1xf32>
    %4 = vector.broadcast %3 : vector<32x1xf32> to vector<32x512xf32>
    %5 = arith.addf %2, %4 : vector<32x512xf32>
    %c0_5 = arith.constant 0 : index
    %c0_6 = arith.constant 0 : index
    %6 = vector.load %arg5[%c0_5, %c0_6] : memref<32x512xf32, #tpu.memory_space<vmem>>, vector<32x512xf32>
    tpu.vector_store %arg5[%c0_5, %c0_6], %5 {strides = array<i32>} : memref<32x512xf32, #tpu.memory_space<vmem>>, vector<32x512xf32>,
    return
  }
  func.func @transform_0(%arg0: i32, %arg1: i32) -> (i32, i32) {
    %c0_i32 = arith.constant 0 : i32
    %c0_i32_0 = arith.constant 0 : i32
    return %arg1, %c0_i32 : i32, i32
  }
  func.func @transform_1(%arg0: i32, %arg1: i32) -> (i32, i32) {
    %c0_i32 = arith.constant 0 : i32
    %c0_i32_0 = arith.constant 0 : i32
    return %c0_i32, %arg0 : i32, i32
  }
  func.func @transform_2(%arg0: i32, %arg1: i32) -> (i32, i32) {
    %c0_i32 = arith.constant 0 : i32
    %c0_i32_0 = arith.constant 0 : i32
    return %arg1, %c0_i32 : i32, i32
  }
  func.func @transform_3(%arg0: i32, %arg1: i32) -> (i32, i32) {
    %c0_i32 = arith.constant 0 : i32
    return %arg1, %arg0 : i32, i32
  }
}

module attributes {stable_mosaic.version = 11 : i64} {
  func.func @_rpn_modulator_kernel(%arg0: i32, %arg1: i32, %arg2: memref<32x32xf32, #tpu.memory_space<vmem>>, %arg3: memref<32x512xf32, #tpu.memory_space<vmem>>, %arg4: memref<32x1xf32, #tpu.memory_space<vmem>>, %arg5: memref<32x512xf32, #tpu.memory_space<vmem>>) attributes {dimension_semantics = [#tpu.dimension_semantics<parallel>, #tpu.dimension_semantics<parallel>], iteration_bounds = array<i64: 2, 1>, scalar_prefetch = 0 : i64, scratch_operands = 0 : i64, tpu.core_type = #tpu.core_type<tc>, window_params = [{transform_indices = @transform_0, window_bounds = array<i64: 32, 32>}, {transform_indices = @transform_1, window_bounds = array<i64: 32, 512>}, {transform_indices = @transform_2, window_bounds = array<i64: 32, 1>}, {transform_indices = @transform_3, window_bounds = array<i64: 32, 512>}]} {
    %c0 = arith.constant 0 : index
    %c0_0 = arith.constant 0 : index
    %0 = vector.load %arg2[%c0, %c0_0] : memref<32x32xf32, #tpu.memory_space<vmem>>, vector<32x32xf32>
    %c0_1 = arith.constant 0 : index
    %c0_2 = arith.constant 0 : index
    %1 = vector.load %arg3[%c0_1, %c0_2] : memref<32x512xf32, #tpu.memory_space<vmem>>, vector<32x512xf32>
    %cst = arith.constant dense<0.000000e+00> : vector<32x512xf32>
    %2 = tpu.matmul %0, %1, %cst {dimension_numbers = #tpu.dot_dimension_numbers<[1], [0], [0], [1], [0, 0, 1, 1], [], []>} : vector<32x32xf32>, vector<32x512xf32>, vector<32x512xf32> -> vector<32x512xf32>
    %c0_3 = arith.constant 0 : index
    %c0_4 = arith.constant 0 : index
    %3 = vector.load %arg4[%c0_3, %c0_4] : memref<32x1xf32, #tpu.memory_space<vmem>>, vector<32x1xf32>
    %4 = vector.broadcast %3 : vector<32x1xf32> to vector<32x512xf32>
    %5 = arith.addf %2, %4 : vector<32x512xf32>
    %c0_5 = arith.constant 0 : index
    %c0_6 = arith.constant 0 : index
    %6 = vector.load %arg5[%c0_5, %c0_6] : memref<32x512xf32, #tpu.memory_space<vmem>>, vector<32x512xf32>
    tpu.vector_store %arg5[%c0_5, %c0_6], %5 {strides = array<i32>} : memref<32x512xf32, #tpu.memory_space<vmem>>, vector<32x512xf32>,
    return
  }
  func.func @transform_0(%arg0: i32, %arg1: i32) -> (i32, i32) {
    %c0_i32 = arith.constant 0 : i32
    %c0_i32_0 = arith.constant 0 : i32
    return %arg1, %c0_i32 : i32, i32
  }
  func.func @transform_1(%arg0: i32, %arg1: i32) -> (i32, i32) {
    %c0_i32 = arith.constant 0 : i32
    %c0_i32_0 = arith.constant 0 : i32
    return %c0_i32, %arg0 : i32, i32
  }
  func.func @transform_2(%arg0: i32, %arg1: i32) -> (i32, i32) {
    %c0_i32 = arith.constant 0 : i32
    %c0_i32_0 = arith.constant 0 : i32
    return %arg1, %c0_i32 : i32, i32
  }
  func.func @transform_3(%arg0: i32, %arg1: i32) -> (i32, i32) {
    %c0_i32 = arith.constant 0 : i32
    return %arg1, %arg0 : i32, i32
  }
}

</mosaic_0001>

<bundles_post_ra>
// kernel: tpu_custom_call.1
= control target key start
LH: loop header
LB: loop body
LE: loop exit
PB: predicated region body
PF: predicated region fallthrough
CT: control target
= control target key end

     0   :  { %8 = vsyncpa [#allocation3], 0  ;;  %s1022_s0 = inlined_call_operand.vmem [shape: f32[32,32], index: 0, kind: input, shape index: {}]   ;;  %s1023_s1 = inlined_call_operand.hbm [shape: f32[32,1024], index: 1, kind: input, shape index: {}]   ;;  %s1024_s2 = inlined_call_operand.vmem [shape: f32[32,1], index: 2, kind: input, shape index: {}]   ;;  %s1025_s3 = inlined_call_operand.hbm [shape: f32[32,1024], index: 3, kind: output, shape index: {}]  }
   0x1   :  { %10 = vsyncpa [#allocation3 + $0x1], 0 }
   0x2   :  { %11 = vsyncpa [#allocation4], 0 }
   0x3   :  { %13 = vsyncpa [#allocation4 + $0x1], 0  ;;  %s821_s12 = smov 0   ;;  %s823_s13 = smov 0  }
   0x4   :  { %s825_s14 = smov 0   ;;  %s827_s15 = smov 0  }
   0x5   :  { %s829_s16 = smov 0   ;;  %s831_s17 = smov 0  }
   0x6 LB: > { %s574_s18 = sadd.s32 4294967295, %s792_s17   ;;  %s575_s19 = sadd.s32 4294967294, %s792_s17   ;;  %s792_s17 = sphi %s831_s17, %s19_s17   ;;  %s788_s16 = sphi %s829_s16, %s1034_s16   ;;  %s784_s15 = sphi %s827_s15, %s1033_s15   ;;  %s780_s14 = sphi %s825_s14, %s1032_s14   ;;  %s776_s13 = sphi %s823_s13, %s1031_s13   ;;  %s772_s12 = sphi %s821_s12, %s1030_s12  }
   0x7   : > { %s31_s20 = sadd.s32 1, %s788_s16  ;;  %s64_s21 = sadd.s32 1, %s780_s14 }
   0x8   : > { %p33_p0 = scmp.ge.s32.totalorder %s31_s20, 2  ;;  %p71_p1 = scmp.ne.s32.totalorder %s780_s14, %s776_s13 }
   0x9   : > { %p72_p2 = scmp.eq.s32.totalorder %s792_s17, 0  ;;  %p77_p3 = scmp.ne.s32.totalorder %s776_s13, %s772_s12 }
   0xa   : > { %s1036_s20 = smov (%p33_p0, %s31_s20), 0  ;;  %p78_p5 = scmp.eq.s32.totalorder %s574_s18, 0 }
   0xb   : > { %p862_p4 = por %p72_p2, %p71_p1  ;;  %s61_s23 = ssub.s32 %s788_s16, %s1036_s20 }
   0xc   : > { %p129_p6 = scmp.eq.s32.totalorder %s574_s18, 1  ;;  %p62_p7 = scmp.eq.s32.totalorder %s61_s23, 0 }
   0xd   : > { %p868_p8 = por %p78_p5, %p77_p3  ;;  %p135_p10 = scmp.eq.s32.totalorder %s575_s19, 1 }
   0xe   : > { %p872_p9 = por %p129_p6, %p71_p1  ;;  %p579_p12 = scmp.ge.s32.totalorder %s792_s17, 2 }
   0xf   : > { %s877_s26 = scalar_select %p62_p7, %s780_s14, %s64_s21  }
  0x10   : > { %p879_p11 = por %p135_p10, %p77_p3  ;;  %p621_p13 = scmp.lt.s32.totalorder %s792_s17, 2 }
  0x11   : > { %s173_s28 = sand.u32 1, %s780_s14   ;;  %s607_s30 = sshll.u32 %s788_s16, 5 }
  0x12   : > { %s580_s29 = sshll.u32 %s173_s28, 7  ;;  %s182_s6 = scalar_lea.hbm %s1023_s1, %s607_s30 }
  0x13   : > { %s177_s7 = scalar_lea.vmem [#allocation2], %s580_s29  ;;  %s183_s9 = sshll.u32 %s182_s6, 4  ;;  %s184_s9 = int_to_ptr.hbm [resolvable:$true] %s183_s9 }
  0x14   : > { %s185_s8 = sshll.u32 %s177_s7, 4  ;;  %p614_p0 = pnand %p621_p13, %p862_p4  ;;  %s186_s8 = int_to_ptr.vmem [resolvable:$true] %s185_s8 }
  0x15   : > { %s174_s10 = scalar_lea.sflag [#allocation3], %s173_s28  ;;  %s794_s11 = smov 1024  }
  0x16   : > { %s795_s18 = smov 512   ;;  %s796_s19 = smov 32  }
  0x17   : > { %616 = dma.hbm_to_vmem [thread:$0]  (!%p614_p0), %s184_s9, 2048, %s186_s8, %s174_s10, %s794_s11, %s795_s18, %s796_s19  }
  0x18   : > { %p583_p1 = scmp.ge.s32.totalorder %s792_s17, 1  ;;  %p193_p2 = scmp.lt.s32.totalorder %s792_s17, 3 }
  0x1a   : > { %p194_p3 = pnand %p583_p1, %p193_p2 }
  0x1b   : > { %s895_s21 = sand.u32 (!%p194_p3), 1, %s776_s13  }
  0x1c   : > { %197 = sbr.rel (%p194_p3) target bundleno = 209 (0xd1), region = 32  ;;  %s584_s23 = sshll.u32 (!%p194_p3), %s895_s21, 7 }
  0x1d   : > { %s200_s29 = scalar_lea.sflag (!%p194_p3), [#allocation3], %s895_s21  ;;  %s901_s22 = scalar_lea.vmem (!%p194_p3), [#allocation2], %s584_s23 }
  0x21   : > { %763 = dma.done.wait (%p868_p8), %s200_s29, 2048  }
  0x22   : > { %765 = vsyncadd (%p868_p8), %s200_s29, 4294965248  ;;  %v797_v0 = vmov 0   ;;  %v268_v1 = vld [vmem:[%s901_s22 + $0x60] sm:$0xff]  ;;  %v269_v2 = vld [vmem:[%s901_s22 + $0x68] sm:$0xff]  ;;  %vm296_vm0 = vcmask 261120   ;;  %s965_s28 = scalar_lea.vmem [#allocation5], %s584_s23 }
  0x23   : > { %678 = vset.pattern.permute.xlu0 %v797_v0  ;;  %679 = vset.pattern.permute.xlu1 %v797_v0  ;;  %v270_v3 = vld [vmem:[%s901_s22 + $0x70] sm:$0xff]  ;;  %v271_v4 = vld [vmem:[%s901_s22 + $0x78] sm:$0xff]  ;;  %v264_v5 = vld [vmem:[%s901_s22 + $0x40] sm:$0xff]  ;;  %s608_s23 = sshll.u32 %s784_s15, 5  ;;  %s457_s6 = sshll.u32 %s965_s28, 4  ;;  %s458_s6 = int_to_ptr.vmem [resolvable:$true] %s457_s6 }
  0x24   : > { %321 = vmatpush.msra.mxu0 %v268_v1  ;;  %350 = vmatpush.msra.mxu1 %v269_v2  ;;  %v265_v6 = vld [vmem:[%s901_s22 + $0x48] sm:$0xff]  ;;  %v266_v7 = vld [vmem:[%s901_s22 + $0x50] sm:$0xff]  ;;  %v267_v8 = vld [vmem:[%s901_s22 + $0x58] sm:$0xff]  ;;  %s456_s5 = scalar_lea.hbm %s1025_s3, %s608_s23  ;;  %s442_s7 = scalar_lea.sflag [#allocation4], %s895_s21 }
  0x25   : > { %379 = vmatpush.msra.mxu2 %v270_v3  ;;  %408 = vmatpush.msra.mxu3 %v271_v4  ;;  %v260_v9 = vld [vmem:[%s901_s22 + $0x20] sm:$0xff]  ;;  %v261_v10 = vld [vmem:[%s901_s22 + $0x28] sm:$0xff]  ;;  %v262_v11 = vld [vmem:[%s901_s22 + $0x30] sm:$0xff]  ;;  %s459_s15 = sshll.u32 %s456_s5, 4  ;;  %s730_s18 = scalar_lea.hbm %s1025_s3, 256  ;;  %s460_s15 = int_to_ptr.hbm [resolvable:$true] %s459_s15 }
  0x26   : > { %322 = vmatpush.msra.mxu0 %v264_v5  ;;  %351 = vmatpush.msra.mxu1 %v265_v6  ;;  %v263_v12 = vld [vmem:[%s901_s22 + $0x38] sm:$0xff]  ;;  %v256_v13 = vld [vmem:[%s901_s22] sm:$0xff]  ;;  %v257_v14 = vld [vmem:[%s901_s22 + $0x8] sm:$0xff]  ;;  %s724_s8 = sshra.s32 %s460_s15, 4  ;;  %s725_s8 = int_to_ptr.hbm [resolvable:$true] %s724_s8 }
  0x27   : > { %380 = vmatpush.msra.mxu2 %v266_v7  ;;  %409 = vmatpush.msra.mxu3 %v267_v8  ;;  %v258_v15 = vld [vmem:[%s901_s22 + $0x10] sm:$0xff]  ;;  %v259_v16 = vld [vmem:[%s901_s22 + $0x18] sm:$0xff]  ;;  %v252_v17 = vld [vmem:[%s1022_s0] sm:$0xff]  ;;  %s726_s9 = scalar_lea.hbm %s725_s8, 128  ;;  %p731_p7 = scmp.lt.s32.totalorder %s725_s8, %s1025_s3 }
  0x28   : > { %323 = vmatpush.msra.mxu0 %v260_v9  ;;  %352 = vmatpush.msra.mxu1 %v261_v10  ;;  %v272_v18 = vld [vmem:[%s1024_s2] sm:$0xff]  ;;  %v274_v19 = vld [vmem:[%s1024_s2 + $0x10] sm:$0xff]  ;;  %v253_v20 = vld [vmem:[%s1022_s0 + $0x8] sm:$0xff]  ;;  %p727_p4 = scmp.ne.s32.totalorder %s725_s8, %s726_s9  ;;  %p732_p8 = scmp.lt.s32.totalorder %s730_s18, %s726_s9 }
  0x29   : > { %381 = vmatpush.msra.mxu2 %v262_v11  ;;  %410 = vmatpush.msra.mxu3 %v263_v12  ;;  %v273_v21 = vld [vmem:[%s1024_s2 + $0x8] sm:$0xff]  ;;  %v275_v22 = vld [vmem:[%s1024_s2 + $0x18] sm:$0xff]  ;;  %v254_v23 = vld [vmem:[%s1022_s0 + $0x10] sm:$0xff] }
  0x2a   : > { %324 = vmatpush.msra.mxu0 %v256_v13  ;;  %353 = vmatpush.msra.mxu1 %v257_v14  ;;  %v255_v24 = vld [vmem:[%s1022_s0 + $0x18] sm:$0xff]  ;;  %p728_p5 = pnand %p727_p4, %p872_p9  ;;  %p733_p10 = por %p732_p8, %p731_p7 }
  0x2b   : > { %382 = vmatpush.msra.mxu2 %v258_v15  ;;  %411 = vmatpush.msra.mxu3 %v259_v16 }
  0x2c   : > { %586 = vmatmul.msk.f32.vlgmr.msra.gmra.mxu0 %vm296_vm0, %v252_v17  ;;  %590 = vmatmul.msk.f32.vlgmr.msra.gmra.mxu1 %vm296_vm0, %v252_v17  ;;  %p729_p6 = pneg %p728_p5 }
  0x2d   : > { %594 = vmatmul.msk.f32.vlgmr.msra.gmra.mxu2 %vm296_vm0, %v252_v17  ;;  %598 = vmatmul.msk.f32.vlgmr.msra.gmra.mxu3 %vm296_vm0, %v252_v17 }
  0x2e   : > { %278 = vperm.xlu0 %678, %v272_v18   ;;  %288 = vperm.xlu1 %679, %v274_v19   ;;  %p734_p13 = pnand %p733_p10, %p729_p6 }
  0x34   : > { %587 = vmatmul.msk.f32.gmra.mxu0 %vm296_vm0, %v253_v20  ;;  %591 = vmatmul.msk.f32.gmra.mxu1 %vm296_vm0, %v253_v20 }
  0x35   : > { %595 = vmatmul.msk.f32.gmra.mxu2 %vm296_vm0, %v253_v20  ;;  %599 = vmatmul.msk.f32.gmra.mxu3 %vm296_vm0, %v253_v20 }
  0x36   : > { %283 = vperm.xlu0 %678, %v273_v21   ;;  %293 = vperm.xlu1 %679, %v275_v22  }
  0x3c   : > { %588 = vmatmul.msk.f32.gmra.mxu0 %vm296_vm0, %v254_v23  ;;  %592 = vmatmul.msk.f32.gmra.mxu1 %vm296_vm0, %v254_v23 }
  0x3d   : > { %596 = vmatmul.msk.f32.gmra.mxu2 %vm296_vm0, %v254_v23  ;;  %600 = vmatmul.msk.f32.gmra.mxu3 %vm296_vm0, %v254_v23 }
  0x44   : > { %589 = vmatmul.msk.f32.gmra.mxu0 %vm296_vm0, %v255_v24  ;;  %593 = vmatmul.msk.f32.gmra.mxu1 %vm296_vm0, %v255_v24 }
  0x45   : > { %597 = vmatmul.msk.f32.gmra.mxu2 %vm296_vm0, %v255_v24  ;;  %601 = vmatmul.msk.f32.gmra.mxu3 %vm296_vm0, %v255_v24 }
  0xa0   : > { %v279_v25 = vpop.permute.xlu0 %278  ;;  %v289_v39 = vpop.permute.xlu1 %288 }
  0xa8   : > { %v284_v30 = vpop.permute.xlu0 %283  ;;  %v294_v48 = vpop.permute.xlu1 %293 }
  0xa9   : > { %v326_v26 = vpop.f32.mrf.mxu0  ;;  %v355_v27 = vpop.f32.mrf.mxu1 }
  0xaa   : > { %v327_v28 = vadd.f32 %v326_v26, %v279_v25  ;;  %v356_v29 = vadd.f32 %v355_v27, %v279_v25 }
  0xac   : > { %425 = vst [vmem:[%s965_s28] sm:$0xff] %v327_v28 }
  0xad   : > { %426 = vst [vmem:[%s965_s28 + $0x8] sm:$0xff] %v356_v29 }
  0xb0   : > { %v384_v31 = vpop.f32.mrf.mxu2  ;;  %v413_v32 = vpop.f32.mrf.mxu3 }
  0xb1   : > { %v385_v33 = vadd.f32 %v384_v31, %v279_v25  ;;  %v414_v34 = vadd.f32 %v413_v32, %v279_v25  ;;  %v329_v35 = vpop.f32.mrf.mxu0  ;;  %v358_v36 = vpop.f32.mrf.mxu1 }
  0xb2   : > { %v330_v37 = vadd.f32 %v329_v35, %v284_v30  ;;  %v359_v38 = vadd.f32 %v358_v36, %v284_v30 }
  0xb3   : > { %427 = vst [vmem:[%s965_s28 + $0x10] sm:$0xff] %v385_v33 }
  0xb4   : > { %428 = vst [vmem:[%s965_s28 + $0x18] sm:$0xff] %v414_v34 }
  0xb5   : > { %429 = vst [vmem:[%s965_s28 + $0x20] sm:$0xff] %v330_v37 }
  0xb6   : > { %430 = vst [vmem:[%s965_s28 + $0x28] sm:$0xff] %v359_v38 }
  0xb8   : > { %v387_v40 = vpop.f32.mrf.mxu2  ;;  %v416_v41 = vpop.f32.mrf.mxu3 }
  0xb9   : > { %v388_v42 = vadd.f32 %v387_v40, %v284_v30  ;;  %v417_v43 = vadd.f32 %v416_v41, %v284_v30  ;;  %v332_v44 = vpop.f32.mrf.mxu0  ;;  %v361_v45 = vpop.f32.mrf.mxu1 }
  0xba   : > { %v333_v46 = vadd.f32 %v332_v44, %v289_v39  ;;  %v362_v47 = vadd.f32 %v361_v45, %v289_v39 }
  0xbb   : > { %431 = vst [vmem:[%s965_s28 + $0x30] sm:$0xff] %v388_v42 }
  0xbc   : > { %432 = vst [vmem:[%s965_s28 + $0x38] sm:$0xff] %v417_v43 }
  0xbd   : > { %433 = vst [vmem:[%s965_s28 + $0x40] sm:$0xff] %v333_v46 }
  0xbe   : > { %434 = vst [vmem:[%s965_s28 + $0x48] sm:$0xff] %v362_v47 }
  0xc0   : > { %v390_v49 = vpop.f32.mrf.mxu2  ;;  %v419_v50 = vpop.f32.mrf.mxu3 }
  0xc1   : > { %v391_v51 = vadd.f32 %v390_v49, %v289_v39  ;;  %v420_v52 = vadd.f32 %v419_v50, %v289_v39  ;;  %v335_v53 = vpop.f32.mrf.mxu0  ;;  %v364_v54 = vpop.f32.mrf.mxu1 }
  0xc2   : > { %v336_v55 = vadd.f32 %v335_v53, %v294_v48  ;;  %v365_v56 = vadd.f32 %v364_v54, %v294_v48 }
  0xc3   : > { %435 = vst [vmem:[%s965_s28 + $0x50] sm:$0xff] %v391_v51 }
  0xc4   : > { %436 = vst [vmem:[%s965_s28 + $0x58] sm:$0xff] %v420_v52 }
  0xc5   : > { %437 = vst [vmem:[%s965_s28 + $0x60] sm:$0xff] %v336_v55 }
  0xc6   : > { %438 = vst [vmem:[%s965_s28 + $0x68] sm:$0xff] %v365_v56 }
  0xc8   : > { %v393_v57 = vpop.f32.mrf.mxu2  ;;  %v422_v58 = vpop.f32.mrf.mxu3 }
  0xc9   : > { %v394_v59 = vadd.f32 %v393_v57, %v294_v48  ;;  %v423_v60 = vadd.f32 %v422_v58, %v294_v48 }
  0xcb   : > { %439 = vst [vmem:[%s965_s28 + $0x70] sm:$0xff] %v394_v59 }
  0xcc   : > { %440 = vst [vmem:[%s965_s28 + $0x78] sm:$0xff] %v423_v60 }
  0xcd   : > { %737 = shalt.err (!%p734_p13)
}
  0xce   : > { %s798_s21 = smov 512   ;;  %s799_s22 = smov 1024  }
  0xcf   : > { %s800_s24 = smov 32  }
  0xd0   : > { %611 = dma.vmem_to_hbm [thread:$0]  (%p872_p9), %s458_s6, 2048, %s460_s15, %s442_s7, %s798_s21, %s799_s22, %s800_s24  }
  0xd1 PF: > { %s474_s28 = sand.u32 1, %s772_s12   ;;  %p618_p0 = pnand %p579_p12, %p879_p11 }
  0xd2   : > { %s475_s23 = scalar_lea.sflag [#allocation4], %s474_s28 }
  0xd3   : > { %p619_p1 = pneg %p618_p0 }
  0xd5   : > { %767 = dma.done.wait (%p619_p1), %s475_s23, 2048  }
  0xd6   : > { %769 = vsyncadd (%p619_p1), %s475_s23, 4294965248  ;;  %s19_s17 = sadd.s32 1, %s792_s17   ;;  %s1030_s12 = smov %s776_s13 }
  0xd7   : > { %p16_p2 = scmp.ge.s32.totalorder %s19_s17, 4   ;;  %s1031_s13 = smov %s780_s14 }
  0xd8   : > { %s1032_s14 = smov %s877_s26  ;;  %s1033_s15 = smov %s788_s16 }
  0xd9   : > { %s1034_s16 = smov %s1036_s20  ;;  %18 = sbr.rel (!%p16_p2) target bundleno = 6 (0x6), region = 83 }
  0xde   :  { %481 = vsyncpa [#allocation3], 1 }
  0xdf   :  { %483 = vsyncpa [#allocation3 + $0x1], 1 }
  0xe0   :  { %484 = vsyncpa [#allocation4], 1 }
  0xe1   :  { %486 = vsyncpa [#allocation4 + $0x1], 1 }

// kernel: tpu_custom_call.1
= control target key start
LH: loop header
LB: loop body
LE: loop exit
PB: predicated region body
PF: predicated region fallthrough
CT: control target
= control target key end

     0   :  { %8 = vsyncpa [#allocation3], 0  ;;  %s1022_s0 = inlined_call_operand.vmem [shape: f32[32,32], index: 0, kind: input, shape index: {}]   ;;  %s1023_s1 = inlined_call_operand.hbm [shape: f32[32,1024], index: 1, kind: input, shape index: {}]   ;;  %s1024_s2 = inlined_call_operand.vmem [shape: f32[32,1], index: 2, kind: input, shape index: {}]   ;;  %s1025_s3 = inlined_call_operand.hbm [shape: f32[32,1024], index: 3, kind: output, shape index: {}]  }
   0x1   :  { %10 = vsyncpa [#allocation3 + $0x1], 0 }
   0x2   :  { %11 = vsyncpa [#allocation4], 0 }
   0x3   :  { %13 = vsyncpa [#allocation4 + $0x1], 0  ;;  %s821_s12 = smov 0   ;;  %s823_s13 = smov 0  }
   0x4   :  { %s825_s14 = smov 0   ;;  %s827_s15 = smov 0  }
   0x5   :  { %s829_s16 = smov 0   ;;  %s831_s17 = smov 0  }
   0x6 LB: > { %s574_s18 = sadd.s32 4294967295, %s792_s17   ;;  %s575_s19 = sadd.s32 4294967294, %s792_s17   ;;  %s792_s17 = sphi %s831_s17, %s19_s17   ;;  %s788_s16 = sphi %s829_s16, %s1034_s16   ;;  %s784_s15 = sphi %s827_s15, %s1033_s15   ;;  %s780_s14 = sphi %s825_s14, %s1032_s14   ;;  %s776_s13 = sphi %s823_s13, %s1031_s13   ;;  %s772_s12 = sphi %s821_s12, %s1030_s12  }
   0x7   : > { %s31_s20 = sadd.s32 1, %s788_s16  ;;  %s64_s21 = sadd.s32 1, %s780_s14 }
   0x8   : > { %p33_p0 = scmp.ge.s32.totalorder %s31_s20, 2  ;;  %p71_p1 = scmp.ne.s32.totalorder %s780_s14, %s776_s13 }
   0x9   : > { %p72_p2 = scmp.eq.s32.totalorder %s792_s17, 0  ;;  %p77_p3 = scmp.ne.s32.totalorder %s776_s13, %s772_s12 }
   0xa   : > { %s1036_s20 = smov (%p33_p0, %s31_s20), 0  ;;  %p78_p5 = scmp.eq.s32.totalorder %s574_s18, 0 }
   0xb   : > { %p862_p4 = por %p72_p2, %p71_p1  ;;  %s61_s23 = ssub.s32 %s788_s16, %s1036_s20 }
   0xc   : > { %p129_p6 = scmp.eq.s32.totalorder %s574_s18, 1  ;;  %p62_p7 = scmp.eq.s32.totalorder %s61_s23, 0 }
   0xd   : > { %p868_p8 = por %p78_p5, %p77_p3  ;;  %p135_p10 = scmp.eq.s32.totalorder %s575_s19, 1 }
   0xe   : > { %p872_p9 = por %p129_p6, %p71_p1  ;;  %p579_p12 = scmp.ge.s32.totalorder %s792_s17, 2 }
   0xf   : > { %s877_s26 = scalar_select %p62_p7, %s780_s14, %s64_s21  }
  0x10   : > { %p879_p11 = por %p135_p10, %p77_p3  ;;  %p621_p13 = scmp.lt.s32.totalorder %s792_s17, 2 }
  0x11   : > { %s173_s28 = sand.u32 1, %s780_s14   ;;  %s607_s30 = sshll.u32 %s788_s16, 5 }
  0x12   : > { %s580_s29 = sshll.u32 %s173_s28, 7  ;;  %s182_s6 = scalar_lea.hbm %s1023_s1, %s607_s30 }
  0x13   : > { %s177_s7 = scalar_lea.vmem [#allocation2], %s580_s29  ;;  %s183_s9 = sshll.u32 %s182_s6, 4  ;;  %s184_s9 = int_to_ptr.hbm [resolvable:$true] %s183_s9 }
  0x14   : > { %s185_s8 = sshll.u32 %s177_s7, 4  ;;  %p614_p0 = pnand %p621_p13, %p862_p4  ;;  %s186_s8 = int_to_ptr.vmem [resolvable:$true] %s185_s8 }
  0x15   : > { %s174_s10 = scalar_lea.sflag [#allocation3], %s173_s28  ;;  %s794_s11 = smov 1024  }
  0x16   : > { %s795_s18 = smov 512   ;;  %s796_s19 = smov 32  }
  0x17   : > { %616 = dma.hbm_to_vmem [thread:$0]  (!%p614_p0), %s184_s9, 2048, %s186_s8, %s174_s10, %s794_s11, %s795_s18, %s796_s19  }
  0x18   : > { %p583_p1 = scmp.ge.s32.totalorder %s792_s17, 1  ;;  %p193_p2 = scmp.lt.s32.totalorder %s792_s17, 3 }
  0x1a   : > { %p194_p3 = pnand %p583_p1, %p193_p2 }
  0x1b   : > { %s895_s21 = sand.u32 (!%p194_p3), 1, %s776_s13  }
  0x1c   : > { %197 = sbr.rel (%p194_p3) target bundleno = 209 (0xd1), region = 32  ;;  %s584_s23 = sshll.u32 (!%p194_p3), %s895_s21, 7 }
  0x1d   : > { %s200_s29 = scalar_lea.sflag (!%p194_p3), [#allocation3], %s895_s21  ;;  %s901_s22 = scalar_lea.vmem (!%p194_p3), [#allocation2], %s584_s23 }
  0x21   : > { %763 = dma.done.wait (%p868_p8), %s200_s29, 2048  }
  0x22   : > { %765 = vsyncadd (%p868_p8), %s200_s29, 4294965248  ;;  %v797_v0 = vmov 0   ;;  %v268_v1 = vld [vmem:[%s901_s22 + $0x60] sm:$0xff]  ;;  %v269_v2 = vld [vmem:[%s901_s22 + $0x68] sm:$0xff]  ;;  %vm296_vm0 = vcmask 261120   ;;  %s965_s28 = scalar_lea.vmem [#allocation5], %s584_s23 }
  0x23   : > { %678 = vset.pattern.permute.xlu0 %v797_v0  ;;  %679 = vset.pattern.permute.xlu1 %v797_v0  ;;  %v270_v3 = vld [vmem:[%s901_s22 + $0x70] sm:$0xff]  ;;  %v271_v4 = vld [vmem:[%s901_s22 + $0x78] sm:$0xff]  ;;  %v264_v5 = vld [vmem:[%s901_s22 + $0x40] sm:$0xff]  ;;  %s608_s23 = sshll.u32 %s784_s15, 5  ;;  %s457_s6 = sshll.u32 %s965_s28, 4  ;;  %s458_s6 = int_to_ptr.vmem [resolvable:$true] %s457_s6 }
  0x24   : > { %321 = vmatpush.msra.mxu0 %v268_v1  ;;  %350 = vmatpush.msra.mxu1 %v269_v2  ;;  %v265_v6 = vld [vmem:[%s901_s22 + $0x48] sm:$0xff]  ;;  %v266_v7 = vld [vmem:[%s901_s22 + $0x50] sm:$0xff]  ;;  %v267_v8 = vld [vmem:[%s901_s22 + $0x58] sm:$0xff]  ;;  %s456_s5 = scalar_lea.hbm %s1025_s3, %s608_s23  ;;  %s442_s7 = scalar_lea.sflag [#allocation4], %s895_s21 }
  0x25   : > { %379 = vmatpush.msra.mxu2 %v270_v3  ;;  %408 = vmatpush.msra.mxu3 %v271_v4  ;;  %v260_v9 = vld [vmem:[%s901_s22 + $0x20] sm:$0xff]  ;;  %v261_v10 = vld [vmem:[%s901_s22 + $0x28] sm:$0xff]  ;;  %v262_v11 = vld [vmem:[%s901_s22 + $0x30] sm:$0xff]  ;;  %s459_s15 = sshll.u32 %s456_s5, 4  ;;  %s730_s18 = scalar_lea.hbm %s1025_s3, 256  ;;  %s460_s15 = int_to_ptr.hbm [resolvable:$true] %s459_s15 }
  0x26   : > { %322 = vmatpush.msra.mxu0 %v264_v5  ;;  %351 = vmatpush.msra.mxu1 %v265_v6  ;;  %v263_v12 = vld [vmem:[%s901_s22 + $0x38] sm:$0xff]  ;;  %v256_v13 = vld [vmem:[%s901_s22] sm:$0xff]  ;;  %v257_v14 = vld [vmem:[%s901_s22 + $0x8] sm:$0xff]  ;;  %s724_s8 = sshra.s32 %s460_s15, 4  ;;  %s725_s8 = int_to_ptr.hbm [resolvable:$true] %s724_s8 }
  0x27   : > { %380 = vmatpush.msra.mxu2 %v266_v7  ;;  %409 = vmatpush.msra.mxu3 %v267_v8  ;;  %v258_v15 = vld [vmem:[%s901_s22 + $0x10] sm:$0xff]  ;;  %v259_v16 = vld [vmem:[%s901_s22 + $0x18] sm:$0xff]  ;;  %v252_v17 = vld [vmem:[%s1022_s0] sm:$0xff]  ;;  %s726_s9 = scalar_lea.hbm %s725_s8, 128  ;;  %p731_p7 = scmp.lt.s32.totalorder %s725_s8, %s1025_s3 }
  0x28   : > { %323 = vmatpush.msra.mxu0 %v260_v9  ;;  %352 = vmatpush.msra.mxu1 %v261_v10  ;;  %v272_v18 = vld [vmem:[%s1024_s2] sm:$0xff]  ;;  %v274_v19 = vld [vmem:[%s1024_s2 + $0x10] sm:$0xff]  ;;  %v253_v20 = vld [vmem:[%s1022_s0 + $0x8] sm:$0xff]  ;;  %p727_p4 = scmp.ne.s32.totalorder %s725_s8, %s726_s9  ;;  %p732_p8 = scmp.lt.s32.totalorder %s730_s18, %s726_s9 }
  0x29   : > { %381 = vmatpush.msra.mxu2 %v262_v11  ;;  %410 = vmatpush.msra.mxu3 %v263_v12  ;;  %v273_v21 = vld [vmem:[%s1024_s2 + $0x8] sm:$0xff]  ;;  %v275_v22 = vld [vmem:[%s1024_s2 + $0x18] sm:$0xff]  ;;  %v254_v23 = vld [vmem:[%s1022_s0 + $0x10] sm:$0xff] }
  0x2a   : > { %324 = vmatpush.msra.mxu0 %v256_v13  ;;  %353 = vmatpush.msra.mxu1 %v257_v14  ;;  %v255_v24 = vld [vmem:[%s1022_s0 + $0x18] sm:$0xff]  ;;  %p728_p5 = pnand %p727_p4, %p872_p9  ;;  %p733_p10 = por %p732_p8, %p731_p7 }
  0x2b   : > { %382 = vmatpush.msra.mxu2 %v258_v15  ;;  %411 = vmatpush.msra.mxu3 %v259_v16 }
  0x2c   : > { %586 = vmatmul.msk.f32.vlgmr.msra.gmra.mxu0 %vm296_vm0, %v252_v17  ;;  %590 = vmatmul.msk.f32.vlgmr.msra.gmra.mxu1 %vm296_vm0, %v252_v17  ;;  %p729_p6 = pneg %p728_p5 }
  0x2d   : > { %594 = vmatmul.msk.f32.vlgmr.msra.gmra.mxu2 %vm296_vm0, %v252_v17  ;;  %598 = vmatmul.msk.f32.vlgmr.msra.gmra.mxu3 %vm296_vm0, %v252_v17 }
  0x2e   : > { %278 = vperm.xlu0 %678, %v272_v18   ;;  %288 = vperm.xlu1 %679, %v274_v19   ;;  %p734_p13 = pnand %p733_p10, %p729_p6 }
  0x34   : > { %587 = vmatmul.msk.f32.gmra.mxu0 %vm296_vm0, %v253_v20  ;;  %591 = vmatmul.msk.f32.gmra.mxu1 %vm296_vm0, %v253_v20 }
  0x35   : > { %595 = vmatmul.msk.f32.gmra.mxu2 %vm296_vm0, %v253_v20  ;;  %599 = vmatmul.msk.f32.gmra.mxu3 %vm296_vm0, %v253_v20 }
  0x36   : > { %283 = vperm.xlu0 %678, %v273_v21   ;;  %293 = vperm.xlu1 %679, %v275_v22  }
  0x3c   : > { %588 = vmatmul.msk.f32.gmra.mxu0 %vm296_vm0, %v254_v23  ;;  %592 = vmatmul.msk.f32.gmra.mxu1 %vm296_vm0, %v254_v23 }
  0x3d   : > { %596 = vmatmul.msk.f32.gmra.mxu2 %vm296_vm0, %v254_v23  ;;  %600 = vmatmul.msk.f32.gmra.mxu3 %vm296_vm0, %v254_v23 }
  0x44   : > { %589 = vmatmul.msk.f32.gmra.mxu0 %vm296_vm0, %v255_v24  ;;  %593 = vmatmul.msk.f32.gmra.mxu1 %vm296_vm0, %v255_v24 }
  0x45   : > { %597 = vmatmul.msk.f32.gmra.mxu2 %vm296_vm0, %v255_v24  ;;  %601 = vmatmul.msk.f32.gmra.mxu3 %vm296_vm0, %v255_v24 }
  0xa0   : > { %v279_v25 = vpop.permute.xlu0 %278  ;;  %v289_v39 = vpop.permute.xlu1 %288 }
  0xa8   : > { %v284_v30 = vpop.permute.xlu0 %283  ;;  %v294_v48 = vpop.permute.xlu1 %293 }
  0xa9   : > { %v326_v26 = vpop.f32.mrf.mxu0  ;;  %v355_v27 = vpop.f32.mrf.mxu1 }
  0xaa   : > { %v327_v28 = vadd.f32 %v326_v26, %v279_v25  ;;  %v356_v29 = vadd.f32 %v355_v27, %v279_v25 }
  0xac   : > { %425 = vst [vmem:[%s965_s28] sm:$0xff] %v327_v28 }
  0xad   : > { %426 = vst [vmem:[%s965_s28 + $0x8] sm:$0xff] %v356_v29 }
  0xb0   : > { %v384_v31 = vpop.f32.mrf.mxu2  ;;  %v413_v32 = vpop.f32.mrf.mxu3 }
  0xb1   : > { %v385_v33 = vadd.f32 %v384_v31, %v279_v25  ;;  %v414_v34 = vadd.f32 %v413_v32, %v279_v25  ;;  %v329_v35 = vpop.f32.mrf.mxu0  ;;  %v358_v36 = vpop.f32.mrf.mxu1 }
  0xb2   : > { %v330_v37 = vadd.f32 %v329_v35, %v284_v30  ;;  %v359_v38 = vadd.f32 %v358_v36, %v284_v30 }
  0xb3   : > { %427 = vst [vmem:[%s965_s28 + $0x10] sm:$0xff] %v385_v33 }
  0xb4   : > { %428 = vst [vmem:[%s965_s28 + $0x18] sm:$0xff] %v414_v34 }
  0xb5   : > { %429 = vst [vmem:[%s965_s28 + $0x20] sm:$0xff] %v330_v37 }
  0xb6   : > { %430 = vst [vmem:[%s965_s28 + $0x28] sm:$0xff] %v359_v38 }
  0xb8   : > { %v387_v40 = vpop.f32.mrf.mxu2  ;;  %v416_v41 = vpop.f32.mrf.mxu3 }
  0xb9   : > { %v388_v42 = vadd.f32 %v387_v40, %v284_v30  ;;  %v417_v43 = vadd.f32 %v416_v41, %v284_v30  ;;  %v332_v44 = vpop.f32.mrf.mxu0  ;;  %v361_v45 = vpop.f32.mrf.mxu1 }
  0xba   : > { %v333_v46 = vadd.f32 %v332_v44, %v289_v39  ;;  %v362_v47 = vadd.f32 %v361_v45, %v289_v39 }
  0xbb   : > { %431 = vst [vmem:[%s965_s28 + $0x30] sm:$0xff] %v388_v42 }
  0xbc   : > { %432 = vst [vmem:[%s965_s28 + $0x38] sm:$0xff] %v417_v43 }
  0xbd   : > { %433 = vst [vmem:[%s965_s28 + $0x40] sm:$0xff] %v333_v46 }
  0xbe   : > { %434 = vst [vmem:[%s965_s28 + $0x48] sm:$0xff] %v362_v47 }
  0xc0   : > { %v390_v49 = vpop.f32.mrf.mxu2  ;;  %v419_v50 = vpop.f32.mrf.mxu3 }
  0xc1   : > { %v391_v51 = vadd.f32 %v390_v49, %v289_v39  ;;  %v420_v52 = vadd.f32 %v419_v50, %v289_v39  ;;  %v335_v53 = vpop.f32.mrf.mxu0  ;;  %v364_v54 = vpop.f32.mrf.mxu1 }
  0xc2   : > { %v336_v55 = vadd.f32 %v335_v53, %v294_v48  ;;  %v365_v56 = vadd.f32 %v364_v54, %v294_v48 }
  0xc3   : > { %435 = vst [vmem:[%s965_s28 + $0x50] sm:$0xff] %v391_v51 }
  0xc4   : > { %436 = vst [vmem:[%s965_s28 + $0x58] sm:$0xff] %v420_v52 }
  0xc5   : > { %437 = vst [vmem:[%s965_s28 + $0x60] sm:$0xff] %v336_v55 }
  0xc6   : > { %438 = vst [vmem:[%s965_s28 + $0x68] sm:$0xff] %v365_v56 }
  0xc8   : > { %v393_v57 = vpop.f32.mrf.mxu2  ;;  %v422_v58 = vpop.f32.mrf.mxu3 }
  0xc9   : > { %v394_v59 = vadd.f32 %v393_v57, %v294_v48  ;;  %v423_v60 = vadd.f32 %v422_v58, %v294_v48 }
  0xcb   : > { %439 = vst [vmem:[%s965_s28 + $0x70] sm:$0xff] %v394_v59 }
  0xcc   : > { %440 = vst [vmem:[%s965_s28 + $0x78] sm:$0xff] %v423_v60 }
  0xcd   : > { %737 = shalt.err (!%p734_p13)
}
  0xce   : > { %s798_s21 = smov 512   ;;  %s799_s22 = smov 1024  }
  0xcf   : > { %s800_s24 = smov 32  }
  0xd0   : > { %611 = dma.vmem_to_hbm [thread:$0]  (%p872_p9), %s458_s6, 2048, %s460_s15, %s442_s7, %s798_s21, %s799_s22, %s800_s24  }
  0xd1 PF: > { %s474_s28 = sand.u32 1, %s772_s12   ;;  %p618_p0 = pnand %p579_p12, %p879_p11 }
  0xd2   : > { %s475_s23 = scalar_lea.sflag [#allocation4], %s474_s28 }
  0xd3   : > { %p619_p1 = pneg %p618_p0 }
  0xd5   : > { %767 = dma.done.wait (%p619_p1), %s475_s23, 2048  }
  0xd6   : > { %769 = vsyncadd (%p619_p1), %s475_s23, 4294965248  ;;  %s19_s17 = sadd.s32 1, %s792_s17   ;;  %s1030_s12 = smov %s776_s13 }
  0xd7   : > { %p16_p2 = scmp.ge.s32.totalorder %s19_s17, 4   ;;  %s1031_s13 = smov %s780_s14 }
  0xd8   : > { %s1032_s14 = smov %s877_s26  ;;  %s1033_s15 = smov %s788_s16 }
  0xd9   : > { %s1034_s16 = smov %s1036_s20  ;;  %18 = sbr.rel (!%p16_p2) target bundleno = 6 (0x6), region = 83 }
  0xde   :  { %481 = vsyncpa [#allocation3], 1 }
  0xdf   :  { %483 = vsyncpa [#allocation3 + $0x1], 1 }
  0xe0   :  { %484 = vsyncpa [#allocation4], 1 }
  0xe1   :  { %486 = vsyncpa [#allocation4 + $0x1], 1 }

</bundles_post_ra>
